<compile_context>
chip_gen: v5e
topology: v5e:2x2
jax: 0.10.0
libtpu: 0.0.40
codegen_flags: <defaults>
</compile_context>

<pallas_src>
import functools
import itertools

import numpy as np
import jax
import jax.numpy as jnp
from jax.experimental import pallas as pl
from jax.experimental.pallas import tpu as pltpu


def _round_up(x, m):
    return ((x + m - 1) // m) * m


# ----------------------------- Pallas kernel -------------------------------

def _giou_diag(p, t, o):
    # p, t: (Bt, 8, Nc) packed cxcywh slabs (coords on sublanes, box idx on
    # lanes); o = 0 selects subject coords (rows 0-3), o = 4 object (rows 4-7).
    # Returns diag(generalized_box_iou(xyxy(p), xyxy(t))) as (Bt, 1, Nc).
    # TODO(synk): generalized_box_iou is an empty stub (`pass`) in the reference
    # source; the standard DETR/torchvision GIoU definition is implemented here
    # (no epsilon — degenerate zero-area boxes would produce inf/NaN).
    pxc, pyc, pw, ph = (p[:, o + k:o + k + 1, :] for k in range(4))
    txc, tyc, tw, th = (t[:, o + k:o + k + 1, :] for k in range(4))
    px0, py0, px1, py1 = pxc - 0.5 * pw, pyc - 0.5 * ph, pxc + 0.5 * pw, pyc + 0.5 * ph
    tx0, ty0, tx1, ty1 = txc - 0.5 * tw, tyc - 0.5 * th, txc + 0.5 * tw, tyc + 0.5 * th
    area_p = (px1 - px0) * (py1 - py0)
    area_t = (tx1 - tx0) * (ty1 - ty0)
    iw = jnp.maximum(jnp.minimum(px1, tx1) - jnp.maximum(px0, tx0), 0.0)
    ih = jnp.maximum(jnp.minimum(py1, ty1) - jnp.maximum(py0, ty0), 0.0)
    inter = iw * ih
    union = area_p + area_t - inter
    iou = inter / union
    cw = jnp.maximum(px1, tx1) - jnp.minimum(px0, tx0)
    ch = jnp.maximum(py1, ty1) - jnp.minimum(py0, ty0)
    carea = cw * ch
    return iou - (carea - union) / carea  # (Bt, 1, Nc)


def _hoi_cost_kernel(labels_ref,     # (Bt, 1, 1)  int32 target object labels
                     pbr_ref,        # (Bt, Nr, 8) pred boxes, row-major packed
                     pbt_ref,        # (Bt, 8, Nc) pred boxes, transposed packed
                     tbt_ref,        # (Bt, 8, Nc) target boxes, transposed packed
                     pscore_ref,     # (Bt, 1, Nc) object-class logits
                     pverb_ref,      # (Bt, V, Nc) verb logits, transposed
                     tverb_ref,      # (Bt, V, Nc) verb labels, transposed
                     out_ref,        # (Bt, Nr, Nc) cost matrix block
                     *, n_valid, w_class, w_verb, w_bbox, w_giou):
    bt, nr, nc = out_ref.shape

    pb = pbr_ref[...]   # (Bt, Nr, 8)  lanes 0-3: sub cxcywh, 4-7: obj cxcywh
    tb = tbt_ref[...]   # (Bt, 8, Nc)  rows  0-3: sub cxcywh, 4-7: obj cxcywh

    # --- cost_bbox[b,i,j] = L1(pred_sub[i], tgt_sub[j]) + L1(pred_obj[i], tgt_obj[j])
    cost_bbox = jnp.zeros((bt, nr, nc), jnp.float32)
    for c in range(8):  # static unroll over the 8 packed coordinates
        cost_bbox += jnp.abs(pb[:, :, c:c + 1] - tb[:, c:c + 1, :])

    # --- cost_giou[b,j] = (1 - giou_diag_sub) + (1 - giou_diag_obj); (Bt, 1, Nc)
    pbt = pbt_ref[...]
    cost_giou = (1.0 - _giou_diag(pbt, tb, 0)) + (1.0 - _giou_diag(pbt, tb, 4))

    # --- cost_verb[b,j] = sum_v BCEwithLogits(verb_logit, verb_label); (Bt, 1, Nc)
    x = pverb_ref[...]
    y = tverb_ref[...]
    bce = jnp.maximum(x, 0.0) - x * y + jnp.log1p(jnp.exp(-jnp.abs(x)))
    cost_verb = jnp.sum(bce, axis=1, keepdims=True)

    # --- cost_class[b]: scalar CE of the length-N object-score logit vector vs
    #     the single target label (padded lanes masked out of the logsumexp).
    scores = pscore_ref[...]                                        # (Bt, 1, Nc)
    lane = jax.lax.broadcasted_iota(jnp.int32, (bt, 1, nc), 2)
    valid = lane < n_valid
    m = jnp.max(jnp.where(valid, scores, -1e30), axis=-1, keepdims=True)
    z = jnp.sum(jnp.where(valid, jnp.exp(scores - m), 0.0), axis=-1, keepdims=True)
    lse = m + jnp.log(z)                                            # (Bt, 1, 1)
    label = labels_ref[...]                                         # (Bt, 1, 1)
    picked = jnp.sum(jnp.where(lane == label, scores, 0.0), axis=-1, keepdims=True)
    cost_class = lse - picked                                       # (Bt, 1, 1)

    # Combine every row-broadcast term once, then a single broadcast-add.
    row = w_class * cost_class + w_verb * cost_verb + w_giou * cost_giou  # (Bt,1,Nc)
    cb = cost_bbox if w_bbox == 1.0 else w_bbox * cost_bbox
    out_ref[...] = cb + row


def _pad_to(x, shape):
    pads = [(0, t - s) for s, t in zip(x.shape, shape)]
    if all(p == (0, 0) for p in pads):
        return x
    # 'edge' padding keeps padded boxes non-degenerate (no NaN from GIoU in
    # padded lanes/batch rows); padded values are sliced away from the output.
    return jnp.pad(x, pads, mode='edge')


def hoi_cost_matrices(pred_sub, pred_obj, pred_score, pred_verb,
                      tgt_sub, tgt_obj, tgt_labels, tgt_verb,
                      *, cost_obj_class=1.0, cost_verb_class=1.0,
                      cost_bbox=1.0, cost_giou=1.0):
    """Compute the (B, N, N) HOI matching cost matrix with a Pallas TPU kernel."""
    B, N, _ = pred_sub.shape
    V = pred_verb.shape[-1]
    f32 = jnp.float32

    # Padded, lane-dense layout.
    Nr = _round_up(N, 8)       # output rows / pred index (sublane multiple)
    Nc = _round_up(N, 128)     # output cols / target index (lane multiple)
    Bt = min(B, 8)             # batch elements per grid step
    Bp = _round_up(B, Bt)

    # Packed box slabs.
    pbox = jnp.concatenate([pred_sub, pred_obj], axis=-1).astype(f32)   # (B, N, 8)
    tbox = jnp.concatenate([tgt_sub, tgt_obj], axis=-1).astype(f32)     # (B, N, 8)
    pbox_rows = _pad_to(pbox, (Bp, Nr, 8))                              # (Bp, Nr, 8)
    pbox_t = _pad_to(jnp.swapaxes(pbox, 1, 2), (Bp, 8, Nc))             # (Bp, 8, Nc)
    tbox_t = _pad_to(jnp.swapaxes(tbox, 1, 2), (Bp, 8, Nc))             # (Bp, 8, Nc)

    pscore = _pad_to(pred_score.astype(f32).reshape(B, 1, N), (Bp, 1, Nc))
    pverb_t = _pad_to(jnp.swapaxes(pred_verb.astype(f32), 1, 2), (Bp, V, Nc))
    tverb_t = _pad_to(jnp.swapaxes(tgt_verb.astype(f32), 1, 2), (Bp, V, Nc))
    labels = _pad_to(tgt_labels.astype(jnp.int32).reshape(B, 1, 1), (Bp, 1, 1))

    kernel = functools.partial(
        _hoi_cost_kernel, n_valid=N,
        w_class=float(cost_obj_class), w_verb=float(cost_verb_class),
        w_bbox=float(cost_bbox), w_giou=float(cost_giou))

    def spec(shape):
        return pl.BlockSpec(shape, lambda b: (b, 0, 0))

    # TODO(synk): for very large N (>=1024) tile the column axis with a second
    # grid dimension instead of a full (Nr, Nc) block to respect v7x VMEM.
    grid_spec = pltpu.PrefetchScalarGridSpec(
        num_scalar_prefetch=0,
        grid=(Bp // Bt,),
        in_specs=[spec((Bt, 1, 1)),        # labels
                  spec((Bt, Nr, 8)),       # pred boxes, row-major packed
                  spec((Bt, 8, Nc)),       # pred boxes, transposed packed
                  spec((Bt, 8, Nc)),       # target boxes, transposed packed
                  spec((Bt, 1, Nc)),       # object-class logits
                  spec((Bt, V, Nc)),       # verb logits
                  spec((Bt, V, Nc))],      # verb labels
        out_specs=spec((Bt, Nr, Nc)))

    out = pl.pallas_call(
        kernel,
        grid_spec=grid_spec,
        out_shape=jax.ShapeDtypeStruct((Bp, Nr, Nc), jnp.float32),
        compiler_params=pltpu.CompilerParams(
            dimension_semantics=("parallel",)),
    )(labels, pbox_rows, pbox_t, tbox_t, pscore, pverb_t, tverb_t)

    return out[:B, :N, :N]


# ------------------------- host-side assignment -----------------------------

def _linear_sum_assignment(cost):
    # TODO(synk): Hungarian assignment is a sequential, data-dependent algorithm
    # with no clean Pallas equivalent; it runs on host (scipy if available).
    try:
        from scipy.optimize import linear_sum_assignment as lsa
        r, c = lsa(cost)
        return np.asarray(r), np.asarray(c)
    except Exception:  # brute-force fallback for tiny N
        n, m = cost.shape
        best, best_cost = None, np.inf
        for perm in itertools.permutations(range(m), n):
            s = sum(cost[i, perm[i]] for i in range(n))
            if s < best_cost:
                best_cost, best = s, perm
        return np.arange(n), np.asarray(best)


class HungarianMatcherHOI:
    """JAX/Pallas port. Inputs are stacked arrays (glue) instead of lists of dicts."""

    def __init__(self, cost_obj_class=1.0, cost_verb_class=1.0,
                 cost_bbox=1.0, cost_giou=1.0):
        self.cost_obj_class = cost_obj_class
        self.cost_verb_class = cost_verb_class
        self.cost_bbox = cost_bbox
        self.cost_giou = cost_giou

    def __call__(self, outputs, targets):
        C = hoi_cost_matrices(
            outputs['sub_boxes'], outputs['obj_boxes'],
            outputs['obj_scores'], outputs['verb_scores'],
            targets['sub_boxes'], targets['obj_boxes'],
            targets['obj_labels'], targets['verb_labels'],
            cost_obj_class=self.cost_obj_class,
            cost_verb_class=self.cost_verb_class,
            cost_bbox=self.cost_bbox, cost_giou=self.cost_giou)
        C_host = np.asarray(jax.block_until_ready(C))
        return [_linear_sum_assignment(C_host[b]) for b in range(C_host.shape[0])]


# ------------------------------ reference -----------------------------------

def _reference_cost_matrices(pred_sub, pred_obj, pred_score, pred_verb,
                             tgt_sub, tgt_obj, tgt_labels, tgt_verb,
                             w_class=1.0, w_verb=1.0, w_bbox=1.0, w_giou=1.0):
    pred_sub, pred_obj = np.asarray(pred_sub, np.float32), np.asarray(pred_obj, np.float32)
    tgt_sub, tgt_obj = np.asarray(tgt_sub, np.float32), np.asarray(tgt_obj, np.float32)
    pred_score, pred_verb = np.asarray(pred_score, np.float32), np.asarray(pred_verb, np.float32)
    tgt_verb = np.asarray(tgt_verb, np.float32)
    tgt_labels = np.asarray(tgt_labels)
    B, N, _ = pred_sub.shape
    out = np.zeros((B, N, N), np.float32)

    def giou_diag(p, t):
        def xyxy(b):
            return np.stack([b[:, 0] - 0.5 * b[:, 2], b[:, 1] - 0.5 * b[:, 3],
                             b[:, 0] + 0.5 * b[:, 2], b[:, 1] + 0.5 * b[:, 3]], -1)
        p, t = xyxy(p), xyxy(t)
        ap = (p[:, 2] - p[:, 0]) * (p[:, 3] - p[:, 1])
        at = (t[:, 2] - t[:, 0]) * (t[:, 3] - t[:, 1])
        iw = np.maximum(np.minimum(p[:, 2], t[:, 2]) - np.maximum(p[:, 0], t[:, 0]), 0)
        ih = np.maximum(np.minimum(p[:, 3], t[:, 3]) - np.maximum(p[:, 1], t[:, 1]), 0)
        inter = iw * ih
        union = ap + at - inter
        cw = np.maximum(p[:, 2], t[:, 2]) - np.minimum(p[:, 0], t[:, 0])
        ch = np.maximum(p[:, 3], t[:, 3]) - np.minimum(p[:, 1], t[:, 1])
        ca = cw * ch
        return inter / union - (ca - union) / ca

    for b in range(B):
        sc = pred_score[b]
        m = sc.max()
        cost_class = (m + np.log(np.exp(sc - m).sum())) - sc[int(tgt_labels[b])]
        x, y = pred_verb[b], tgt_verb[b]
        bce = np.maximum(x, 0) - x * y + np.log1p(np.exp(-np.abs(x)))
        cost_verb = bce.sum(1)                                    # (N,)
        cb = (np.abs(pred_sub[b][:, None, :] - tgt_sub[b][None, :, :]).sum(-1)
              + np.abs(pred_obj[b][:, None, :] - tgt_obj[b][None, :, :]).sum(-1))
        cg = (1 - giou_diag(pred_sub[b], tgt_sub[b])) + (1 - giou_diag(pred_obj[b], tgt_obj[b]))
        out[b] = (w_class * cost_class + w_verb * cost_verb[None, :]
                  + w_bbox * cb + w_giou * cg[None, :])
    return out


# --------------------------------- main --------------------------------------

if __name__ == "__main__":
    key = jax.random.PRNGKey(0)
    B, N, V = 2, 8, 16  # batch, (num preds == num targets, square cost), verb classes
    ks = jax.random.split(key, 8)

    def rand_boxes(k):
        cxy = jax.random.uniform(k, (B, N, 2), minval=0.2, maxval=0.8)
        wh = jax.random.uniform(jax.random.fold_in(k, 1), (B, N, 2), minval=0.05, maxval=0.3)
        return jnp.concatenate([cxy, wh], axis=-1)

    pred_sub, pred_obj = rand_boxes(ks[0]), rand_boxes(ks[1])
    tgt_sub, tgt_obj = rand_boxes(ks[2]), rand_boxes(ks[3])
    pred_score = jax.random.normal(ks[4], (B, N), dtype=jnp.float32)
    pred_verb = jax.random.normal(ks[5], (B, N, V), dtype=jnp.float32)
    tgt_verb = (jax.random.uniform(ks[6], (B, N, V)) > 0.7).astype(jnp.float32)
    tgt_labels = jax.random.randint(ks[7], (B,), 0, N)

    # Run the Pallas kernel (cost matrices).
    C = hoi_cost_matrices(pred_sub, pred_obj, pred_score, pred_verb,
                          tgt_sub, tgt_obj, tgt_labels, tgt_verb)
    C = jax.block_until_ready(C)

    # Correctness check against a pure-numpy reference of the same math.
    C_ref = _reference_cost_matrices(pred_sub, pred_obj, pred_score, pred_verb,
                                     tgt_sub, tgt_obj, tgt_labels, tgt_verb)
    assert np.allclose(np.asarray(C), C_ref, rtol=1e-4, atol=1e-4), "cost matrix mismatch"

    # Full matcher (kernel + host-side Hungarian assignment).
    matcher = HungarianMatcherHOI()
    outputs = {'sub_boxes': pred_sub, 'obj_boxes': pred_obj,
               'obj_scores': pred_score, 'verb_scores': pred_verb}
    targets = {'sub_boxes': tgt_sub, 'obj_boxes': tgt_obj,
               'obj_labels': tgt_labels, 'verb_labels': tgt_verb}
    indices = matcher(outputs, targets)
    assert len(indices) == B and all(len(r) == N for r, _ in indices)

    print("KERNEL_OK")
</pallas_src>

<mosaic_0001>
module attributes {stable_mosaic.version = 11 : i64} {
  func.func @_hoi_cost_kernel(%arg0: i32, %arg1: memref<2x1x1xi32, #tpu.memory_space<vmem>>, %arg2: memref<2x8x8xf32, #tpu.memory_space<vmem>>, %arg3: memref<2x8x128xf32, #tpu.memory_space<vmem>>, %arg4: memref<2x8x128xf32, #tpu.memory_space<vmem>>, %arg5: memref<2x1x128xf32, #tpu.memory_space<vmem>>, %arg6: memref<2x16x128xf32, #tpu.memory_space<vmem>>, %arg7: memref<2x16x128xf32, #tpu.memory_space<vmem>>, %arg8: memref<2x8x128xf32, #tpu.memory_space<vmem>>) attributes {dimension_semantics = [#tpu.dimension_semantics<parallel>], iteration_bounds = array<i64: 1>, scalar_prefetch = 0 : i64, scratch_operands = 0 : i64, tpu.core_type = #tpu.core_type<tc>, window_params = [{transform_indices = @transform_0, window_bounds = array<i64: 2, 1, 1>}, {transform_indices = @transform_1, window_bounds = array<i64: 2, 8, 8>}, {transform_indices = @transform_2, window_bounds = array<i64: 2, 8, 128>}, {transform_indices = @transform_3, window_bounds = array<i64: 2, 8, 128>}, {transform_indices = @transform_4, window_bounds = array<i64: 2, 1, 128>}, {transform_indices = @transform_5, window_bounds = array<i64: 2, 16, 128>}, {transform_indices = @transform_6, window_bounds = array<i64: 2, 16, 128>}, {transform_indices = @transform_7, window_bounds = array<i64: 2, 8, 128>}]} {
    %c0 = arith.constant 0 : index
    %c0_0 = arith.constant 0 : index
    %c0_1 = arith.constant 0 : index
    %0 = vector.load %arg2[%c0, %c0_0, %c0_1] : memref<2x8x8xf32, #tpu.memory_space<vmem>>, vector<2x8x8xf32>
    %c0_2 = arith.constant 0 : index
    %c0_3 = arith.constant 0 : index
    %c0_4 = arith.constant 0 : index
    %1 = vector.load %arg4[%c0_2, %c0_3, %c0_4] : memref<2x8x128xf32, #tpu.memory_space<vmem>>, vector<2x8x128xf32>
    %cst = arith.constant 0.000000e+00 : f32
    %2 = vector.broadcast %cst : f32 to vector<2x8x128xf32>
    %3 = vector.extract_strided_slice %0 {offsets = [0, 0, 0], sizes = [2, 8, 1], strides = [1, 1, 1]} : vector<2x8x8xf32> to vector<2x8x1xf32>
    %4 = vector.extract_strided_slice %1 {offsets = [0, 0, 0], sizes = [2, 1, 128], strides = [1, 1, 1]} : vector<2x8x128xf32> to vector<2x1x128xf32>
    %5 = vector.broadcast %3 : vector<2x8x1xf32> to vector<2x8x128xf32>
    %6 = vector.broadcast %4 : vector<2x1x128xf32> to vector<2x8x128xf32>
    %7 = arith.subf %5, %6 : vector<2x8x128xf32>
    %8 = math.absf %7 : vector<2x8x128xf32>
    %9 = arith.addf %2, %8 : vector<2x8x128xf32>
    %10 = vector.extract_strided_slice %0 {offsets = [0, 0, 1], sizes = [2, 8, 1], strides = [1, 1, 1]} : vector<2x8x8xf32> to vector<2x8x1xf32>
    %11 = vector.extract_strided_slice %1 {offsets = [0, 1, 0], sizes = [2, 1, 128], strides = [1, 1, 1]} : vector<2x8x128xf32> to vector<2x1x128xf32>
    %12 = vector.broadcast %10 : vector<2x8x1xf32> to vector<2x8x128xf32>
    %13 = vector.broadcast %11 : vector<2x1x128xf32> to vector<2x8x128xf32>
    %14 = arith.subf %12, %13 : vector<2x8x128xf32>
    %15 = math.absf %14 : vector<2x8x128xf32>
    %16 = arith.addf %9, %15 : vector<2x8x128xf32>
    %17 = vector.extract_strided_slice %0 {offsets = [0, 0, 2], sizes = [2, 8, 1], strides = [1, 1, 1]} : vector<2x8x8xf32> to vector<2x8x1xf32>
    %18 = vector.extract_strided_slice %1 {offsets = [0, 2, 0], sizes = [2, 1, 128], strides = [1, 1, 1]} : vector<2x8x128xf32> to vector<2x1x128xf32>
    %19 = vector.broadcast %17 : vector<2x8x1xf32> to vector<2x8x128xf32>
    %20 = vector.broadcast %18 : vector<2x1x128xf32> to vector<2x8x128xf32>
    %21 = arith.subf %19, %20 : vector<2x8x128xf32>
    %22 = math.absf %21 : vector<2x8x128xf32>
    %23 = arith.addf %16, %22 : vector<2x8x128xf32>
    %24 = vector.extract_strided_slice %0 {offsets = [0, 0, 3], sizes = [2, 8, 1], strides = [1, 1, 1]} : vector<2x8x8xf32> to vector<2x8x1xf32>
    %25 = vector.extract_strided_slice %1 {offsets = [0, 3, 0], sizes = [2, 1, 128], strides = [1, 1, 1]} : vector<2x8x128xf32> to vector<2x1x128xf32>
    %26 = vector.broadcast %24 : vector<2x8x1xf32> to vector<2x8x128xf32>
    %27 = vector.broadcast %25 : vector<2x1x128xf32> to vector<2x8x128xf32>
    %28 = arith.subf %26, %27 : vector<2x8x128xf32>
    %29 = math.absf %28 : vector<2x8x128xf32>
    %30 = arith.addf %23, %29 : vector<2x8x128xf32>
    %31 = vector.extract_strided_slice %0 {offsets = [0, 0, 4], sizes = [2, 8, 1], strides = [1, 1, 1]} : vector<2x8x8xf32> to vector<2x8x1xf32>
    %32 = vector.extract_strided_slice %1 {offsets = [0, 4, 0], sizes = [2, 1, 128], strides = [1, 1, 1]} : vector<2x8x128xf32> to vector<2x1x128xf32>
    %33 = vector.broadcast %31 : vector<2x8x1xf32> to vector<2x8x128xf32>
    %34 = vector.broadcast %32 : vector<2x1x128xf32> to vector<2x8x128xf32>
    %35 = arith.subf %33, %34 : vector<2x8x128xf32>
    %36 = math.absf %35 : vector<2x8x128xf32>
    %37 = arith.addf %30, %36 : vector<2x8x128xf32>
    %38 = vector.extract_strided_slice %0 {offsets = [0, 0, 5], sizes = [2, 8, 1], strides = [1, 1, 1]} : vector<2x8x8xf32> to vector<2x8x1xf32>
    %39 = vector.extract_strided_slice %1 {offsets = [0, 5, 0], sizes = [2, 1, 128], strides = [1, 1, 1]} : vector<2x8x128xf32> to vector<2x1x128xf32>
    %40 = vector.broadcast %38 : vector<2x8x1xf32> to vector<2x8x128xf32>
    %41 = vector.broadcast %39 : vector<2x1x128xf32> to vector<2x8x128xf32>
    %42 = arith.subf %40, %41 : vector<2x8x128xf32>
    %43 = math.absf %42 : vector<2x8x128xf32>
    %44 = arith.addf %37, %43 : vector<2x8x128xf32>
    %45 = vector.extract_strided_slice %0 {offsets = [0, 0, 6], sizes = [2, 8, 1], strides = [1, 1, 1]} : vector<2x8x8xf32> to vector<2x8x1xf32>
    %46 = vector.extract_strided_slice %1 {offsets = [0, 6, 0], sizes = [2, 1, 128], strides = [1, 1, 1]} : vector<2x8x128xf32> to vector<2x1x128xf32>
    %47 = vector.broadcast %45 : vector<2x8x1xf32> to vector<2x8x128xf32>
    %48 = vector.broadcast %46 : vector<2x1x128xf32> to vector<2x8x128xf32>
    %49 = arith.subf %47, %48 : vector<2x8x128xf32>
    %50 = math.absf %49 : vector<2x8x128xf32>
    %51 = arith.addf %44, %50 : vector<2x8x128xf32>
    %52 = vector.extract_strided_slice %0 {offsets = [0, 0, 7], sizes = [2, 8, 1], strides = [1, 1, 1]} : vector<2x8x8xf32> to vector<2x8x1xf32>
    %53 = vector.extract_strided_slice %1 {offsets = [0, 7, 0], sizes = [2, 1, 128], strides = [1, 1, 1]} : vector<2x8x128xf32> to vector<2x1x128xf32>
    %54 = vector.broadcast %52 : vector<2x8x1xf32> to vector<2x8x128xf32>
    %55 = vector.broadcast %53 : vector<2x1x128xf32> to vector<2x8x128xf32>
    %56 = arith.subf %54, %55 : vector<2x8x128xf32>
    %57 = math.absf %56 : vector<2x8x128xf32>
    %58 = arith.addf %51, %57 : vector<2x8x128xf32>
    %c0_5 = arith.constant 0 : index
    %c0_6 = arith.constant 0 : index
    %c0_7 = arith.constant 0 : index
    %59 = vector.load %arg3[%c0_5, %c0_6, %c0_7] : memref<2x8x128xf32, #tpu.memory_space<vmem>>, vector<2x8x128xf32>
    %60 = vector.extract_strided_slice %59 {offsets = [0, 0, 0], sizes = [2, 1, 128], strides = [1, 1, 1]} : vector<2x8x128xf32> to vector<2x1x128xf32>
    %61 = vector.extract_strided_slice %59 {offsets = [0, 1, 0], sizes = [2, 1, 128], strides = [1, 1, 1]} : vector<2x8x128xf32> to vector<2x1x128xf32>
    %62 = vector.extract_strided_slice %59 {offsets = [0, 2, 0], sizes = [2, 1, 128], strides = [1, 1, 1]} : vector<2x8x128xf32> to vector<2x1x128xf32>
    %63 = vector.extract_strided_slice %59 {offsets = [0, 3, 0], sizes = [2, 1, 128], strides = [1, 1, 1]} : vector<2x8x128xf32> to vector<2x1x128xf32>
    %64 = vector.extract_strided_slice %1 {offsets = [0, 0, 0], sizes = [2, 1, 128], strides = [1, 1, 1]} : vector<2x8x128xf32> to vector<2x1x128xf32>
    %65 = vector.extract_strided_slice %1 {offsets = [0, 1, 0], sizes = [2, 1, 128], strides = [1, 1, 1]} : vector<2x8x128xf32> to vector<2x1x128xf32>
    %66 = vector.extract_strided_slice %1 {offsets = [0, 2, 0], sizes = [2, 1, 128], strides = [1, 1, 1]} : vector<2x8x128xf32> to vector<2x1x128xf32>
    %67 = vector.extract_strided_slice %1 {offsets = [0, 3, 0], sizes = [2, 1, 128], strides = [1, 1, 1]} : vector<2x8x128xf32> to vector<2x1x128xf32>
    %cst_8 = arith.constant 5.000000e-01 : f32
    %68 = vector.broadcast %cst_8 : f32 to vector<2x1x128xf32>
    %69 = arith.mulf %68, %62 : vector<2x1x128xf32>
    %70 = arith.subf %60, %69 : vector<2x1x128xf32>
    %cst_9 = arith.constant 5.000000e-01 : f32
    %71 = vector.broadcast %cst_9 : f32 to vector<2x1x128xf32>
    %72 = arith.mulf %71, %63 : vector<2x1x128xf32>
    %73 = arith.subf %61, %72 : vector<2x1x128xf32>
    %cst_10 = arith.constant 5.000000e-01 : f32
    %74 = vector.broadcast %cst_10 : f32 to vector<2x1x128xf32>
    %75 = arith.mulf %74, %62 : vector<2x1x128xf32>
    %76 = arith.addf %60, %75 : vector<2x1x128xf32>
    %cst_11 = arith.constant 5.000000e-01 : f32
    %77 = vector.broadcast %cst_11 : f32 to vector<2x1x128xf32>
    %78 = arith.mulf %77, %63 : vector<2x1x128xf32>
    %79 = arith.addf %61, %78 : vector<2x1x128xf32>
    %cst_12 = arith.constant 5.000000e-01 : f32
    %80 = vector.broadcast %cst_12 : f32 to vector<2x1x128xf32>
    %81 = arith.mulf %80, %66 : vector<2x1x128xf32>
    %82 = arith.subf %64, %81 : vector<2x1x128xf32>
    %cst_13 = arith.constant 5.000000e-01 : f32
    %83 = vector.broadcast %cst_13 : f32 to vector<2x1x128xf32>
    %84 = arith.mulf %83, %67 : vector<2x1x128xf32>
    %85 = arith.subf %65, %84 : vector<2x1x128xf32>
    %cst_14 = arith.constant 5.000000e-01 : f32
    %86 = vector.broadcast %cst_14 : f32 to vector<2x1x128xf32>
    %87 = arith.mulf %86, %66 : vector<2x1x128xf32>
    %88 = arith.addf %64, %87 : vector<2x1x128xf32>
    %cst_15 = arith.constant 5.000000e-01 : f32
    %89 = vector.broadcast %cst_15 : f32 to vector<2x1x128xf32>
    %90 = arith.mulf %89, %67 : vector<2x1x128xf32>
    %91 = arith.addf %65, %90 : vector<2x1x128xf32>
    %92 = arith.subf %76, %70 : vector<2x1x128xf32>
    %93 = arith.subf %79, %73 : vector<2x1x128xf32>
    %94 = arith.mulf %92, %93 : vector<2x1x128xf32>
    %95 = arith.subf %88, %82 : vector<2x1x128xf32>
    %96 = arith.subf %91, %85 : vector<2x1x128xf32>
    %97 = arith.mulf %95, %96 : vector<2x1x128xf32>
    %98 = arith.minimumf %76, %88 : vector<2x1x128xf32>
    %99 = arith.maximumf %70, %82 : vector<2x1x128xf32>
    %100 = arith.subf %98, %99 : vector<2x1x128xf32>
    %cst_16 = arith.constant 0.000000e+00 : f32
    %101 = vector.broadcast %cst_16 : f32 to vector<2x1x128xf32>
    %102 = arith.maximumf %100, %101 : vector<2x1x128xf32>
    %103 = arith.minimumf %79, %91 : vector<2x1x128xf32>
    %104 = arith.maximumf %73, %85 : vector<2x1x128xf32>
    %105 = arith.subf %103, %104 : vector<2x1x128xf32>
    %cst_17 = arith.constant 0.000000e+00 : f32
    %106 = vector.broadcast %cst_17 : f32 to vector<2x1x128xf32>
    %107 = arith.maximumf %105, %106 : vector<2x1x128xf32>
    %108 = arith.mulf %102, %107 : vector<2x1x128xf32>
    %109 = arith.addf %94, %97 : vector<2x1x128xf32>
    %110 = arith.subf %109, %108 : vector<2x1x128xf32>
    %111 = arith.divf %108, %110 : vector<2x1x128xf32>
    %112 = arith.maximumf %76, %88 : vector<2x1x128xf32>
    %113 = arith.minimumf %70, %82 : vector<2x1x128xf32>
    %114 = arith.subf %112, %113 : vector<2x1x128xf32>
    %115 = arith.maximumf %79, %91 : vector<2x1x128xf32>
    %116 = arith.minimumf %73, %85 : vector<2x1x128xf32>
    %117 = arith.subf %115, %116 : vector<2x1x128xf32>
    %118 = arith.mulf %114, %117 : vector<2x1x128xf32>
    %119 = arith.subf %118, %110 : vector<2x1x128xf32>
    %120 = arith.divf %119, %118 : vector<2x1x128xf32>
    %121 = arith.subf %111, %120 : vector<2x1x128xf32>
    %cst_18 = arith.constant 1.000000e+00 : f32
    %122 = vector.broadcast %cst_18 : f32 to vector<2x1x128xf32>
    %123 = arith.subf %122, %121 : vector<2x1x128xf32>
    %124 = vector.extract_strided_slice %59 {offsets = [0, 4, 0], sizes = [2, 1, 128], strides = [1, 1, 1]} : vector<2x8x128xf32> to vector<2x1x128xf32>
    %125 = vector.extract_strided_slice %59 {offsets = [0, 5, 0], sizes = [2, 1, 128], strides = [1, 1, 1]} : vector<2x8x128xf32> to vector<2x1x128xf32>
    %126 = vector.extract_strided_slice %59 {offsets = [0, 6, 0], sizes = [2, 1, 128], strides = [1, 1, 1]} : vector<2x8x128xf32> to vector<2x1x128xf32>
    %127 = vector.extract_strided_slice %59 {offsets = [0, 7, 0], sizes = [2, 1, 128], strides = [1, 1, 1]} : vector<2x8x128xf32> to vector<2x1x128xf32>
    %128 = vector.extract_strided_slice %1 {offsets = [0, 4, 0], sizes = [2, 1, 128], strides = [1, 1, 1]} : vector<2x8x128xf32> to vector<2x1x128xf32>
    %129 = vector.extract_strided_slice %1 {offsets = [0, 5, 0], sizes = [2, 1, 128], strides = [1, 1, 1]} : vector<2x8x128xf32> to vector<2x1x128xf32>
    %130 = vector.extract_strided_slice %1 {offsets = [0, 6, 0], sizes = [2, 1, 128], strides = [1, 1, 1]} : vector<2x8x128xf32> to vector<2x1x128xf32>
    %131 = vector.extract_strided_slice %1 {offsets = [0, 7, 0], sizes = [2, 1, 128], strides = [1, 1, 1]} : vector<2x8x128xf32> to vector<2x1x128xf32>
    %cst_19 = arith.constant 5.000000e-01 : f32
    %132 = vector.broadcast %cst_19 : f32 to vector<2x1x128xf32>
    %133 = arith.mulf %132, %126 : vector<2x1x128xf32>
    %134 = arith.subf %124, %133 : vector<2x1x128xf32>
    %cst_20 = arith.constant 5.000000e-01 : f32
    %135 = vector.broadcast %cst_20 : f32 to vector<2x1x128xf32>
    %136 = arith.mulf %135, %127 : vector<2x1x128xf32>
    %137 = arith.subf %125, %136 : vector<2x1x128xf32>
    %cst_21 = arith.constant 5.000000e-01 : f32
    %138 = vector.broadcast %cst_21 : f32 to vector<2x1x128xf32>
    %139 = arith.mulf %138, %126 : vector<2x1x128xf32>
    %140 = arith.addf %124, %139 : vector<2x1x128xf32>
    %cst_22 = arith.constant 5.000000e-01 : f32
    %141 = vector.broadcast %cst_22 : f32 to vector<2x1x128xf32>
    %142 = arith.mulf %141, %127 : vector<2x1x128xf32>
    %143 = arith.addf %125, %142 : vector<2x1x128xf32>
    %cst_23 = arith.constant 5.000000e-01 : f32
    %144 = vector.broadcast %cst_23 : f32 to vector<2x1x128xf32>
    %145 = arith.mulf %144, %130 : vector<2x1x128xf32>
    %146 = arith.subf %128, %145 : vector<2x1x128xf32>
    %cst_24 = arith.constant 5.000000e-01 : f32
    %147 = vector.broadcast %cst_24 : f32 to vector<2x1x128xf32>
    %148 = arith.mulf %147, %131 : vector<2x1x128xf32>
    %149 = arith.subf %129, %148 : vector<2x1x128xf32>
    %cst_25 = arith.constant 5.000000e-01 : f32
    %150 = vector.broadcast %cst_25 : f32 to vector<2x1x128xf32>
    %151 = arith.mulf %150, %130 : vector<2x1x128xf32>
    %152 = arith.addf %128, %151 : vector<2x1x128xf32>
    %cst_26 = arith.constant 5.000000e-01 : f32
    %153 = vector.broadcast %cst_26 : f32 to vector<2x1x128xf32>
    %154 = arith.mulf %153, %131 : vector<2x1x128xf32>
    %155 = arith.addf %129, %154 : vector<2x1x128xf32>
    %156 = arith.subf %140, %134 : vector<2x1x128xf32>
    %157 = arith.subf %143, %137 : vector<2x1x128xf32>
    %158 = arith.mulf %156, %157 : vector<2x1x128xf32>
    %159 = arith.subf %152, %146 : vector<2x1x128xf32>
    %160 = arith.subf %155, %149 : vector<2x1x128xf32>
    %161 = arith.mulf %159, %160 : vector<2x1x128xf32>
    %162 = arith.minimumf %140, %152 : vector<2x1x128xf32>
    %163 = arith.maximumf %134, %146 : vector<2x1x128xf32>
    %164 = arith.subf %162, %163 : vector<2x1x128xf32>
    %cst_27 = arith.constant 0.000000e+00 : f32
    %165 = vector.broadcast %cst_27 : f32 to vector<2x1x128xf32>
    %166 = arith.maximumf %164, %165 : vector<2x1x128xf32>
    %167 = arith.minimumf %143, %155 : vector<2x1x128xf32>
    %168 = arith.maximumf %137, %149 : vector<2x1x128xf32>
    %169 = arith.subf %167, %168 : vector<2x1x128xf32>
    %cst_28 = arith.constant 0.000000e+00 : f32
    %170 = vector.broadcast %cst_28 : f32 to vector<2x1x128xf32>
    %171 = arith.maximumf %169, %170 : vector<2x1x128xf32>
    %172 = arith.mulf %166, %171 : vector<2x1x128xf32>
    %173 = arith.addf %158, %161 : vector<2x1x128xf32>
    %174 = arith.subf %173, %172 : vector<2x1x128xf32>
    %175 = arith.divf %172, %174 : vector<2x1x128xf32>
    %176 = arith.maximumf %140, %152 : vector<2x1x128xf32>
    %177 = arith.minimumf %134, %146 : vector<2x1x128xf32>
    %178 = arith.subf %176, %177 : vector<2x1x128xf32>
    %179 = arith.maximumf %143, %155 : vector<2x1x128xf32>
    %180 = arith.minimumf %137, %149 : vector<2x1x128xf32>
    %181 = arith.subf %179, %180 : vector<2x1x128xf32>
    %182 = arith.mulf %178, %181 : vector<2x1x128xf32>
    %183 = arith.subf %182, %174 : vector<2x1x128xf32>
    %184 = arith.divf %183, %182 : vector<2x1x128xf32>
    %185 = arith.subf %175, %184 : vector<2x1x128xf32>
    %cst_29 = arith.constant 1.000000e+00 : f32
    %186 = vector.broadcast %cst_29 : f32 to vector<2x1x128xf32>
    %187 = arith.subf %186, %185 : vector<2x1x128xf32>
    %188 = arith.addf %123, %187 : vector<2x1x128xf32>
    %c0_30 = arith.constant 0 : index
    %c0_31 = arith.constant 0 : index
    %c0_32 = arith.constant 0 : index
    %189 = vector.load %arg6[%c0_30, %c0_31, %c0_32] : memref<2x16x128xf32, #tpu.memory_space<vmem>>, vector<2x16x128xf32>
    %c0_33 = arith.constant 0 : index
    %c0_34 = arith.constant 0 : index
    %c0_35 = arith.constant 0 : index
    %190 = vector.load %arg7[%c0_33, %c0_34, %c0_35] : memref<2x16x128xf32, #tpu.memory_space<vmem>>, vector<2x16x128xf32>
    %cst_36 = arith.constant 0.000000e+00 : f32
    %191 = vector.broadcast %cst_36 : f32 to vector<2x16x128xf32>
    %192 = arith.maximumf %189, %191 : vector<2x16x128xf32>
    %193 = arith.mulf %189, %190 : vector<2x16x128xf32>
    %194 = arith.subf %192, %193 : vector<2x16x128xf32>
    %195 = math.absf %189 : vector<2x16x128xf32>
    %cst_37 = arith.constant 0.000000e+00 : f32
    %196 = vector.broadcast %cst_37 : f32 to vector<2x16x128xf32>
    %197 = arith.subf %196, %195 : vector<2x16x128xf32>
    %198 = math.exp %197 : vector<2x16x128xf32>
    %199 = math.log1p %198 : vector<2x16x128xf32>
    %200 = arith.addf %194, %199 : vector<2x16x128xf32>
    %cst_38 = arith.constant dense<0.000000e+00> : vector<2x128xf32>
    %201 = vector.multi_reduction <add>, %200, %cst_38 [1] : vector<2x16x128xf32> to vector<2x128xf32>
    %202 = vector.shape_cast %201 : vector<2x128xf32> to vector<2x1x128xf32>
    %c0_39 = arith.constant 0 : index
    %c0_40 = arith.constant 0 : index
    %c0_41 = arith.constant 0 : index
    %203 = vector.load %arg5[%c0_39, %c0_40, %c0_41] : memref<2x1x128xf32, #tpu.memory_space<vmem>>, vector<2x1x128xf32>
    %204 = tpu.iota {dimensions = array<i32: 2>} : vector<2x1x128xi32>
    %c8_i32 = arith.constant 8 : i32
    %205 = vector.broadcast %c8_i32 : i32 to vector<2x1x128xi32>
    %206 = arith.cmpi slt, %204, %205 : vector<2x1x128xi32>
    %cst_42 = arith.constant -1.000000e+30 : f32
    %207 = vector.broadcast %cst_42 : f32 to vector<2x1x128xf32>
    %208 = arith.select %206, %203, %207 : vector<2x1x128xi1>, vector<2x1x128xf32>
    %cst_43 = arith.constant dense<0xFF800000> : vector<2x1xf32>
    %209 = vector.multi_reduction <maximumf>, %208, %cst_43 [2] : vector<2x1x128xf32> to vector<2x1xf32>
    %210 = vector.shape_cast %209 : vector<2x1xf32> to vector<2x1x1xf32>
    %211 = vector.broadcast %210 : vector<2x1x1xf32> to vector<2x1x128xf32>
    %212 = arith.subf %203, %211 : vector<2x1x128xf32>
    %213 = math.exp %212 : vector<2x1x128xf32>
    %cst_44 = arith.constant 0.000000e+00 : f32
    %214 = vector.broadcast %cst_44 : f32 to vector<2x1x128xf32>
    %215 = arith.select %206, %213, %214 : vector<2x1x128xi1>, vector<2x1x128xf32>
    %cst_45 = arith.constant dense<0.000000e+00> : vector<2x1xf32>
    %216 = vector.multi_reduction <add>, %215, %cst_45 [2] : vector<2x1x128xf32> to vector<2x1xf32>
    %217 = vector.shape_cast %216 : vector<2x1xf32> to vector<2x1x1xf32>
    %218 = math.log %217 : vector<2x1x1xf32>
    %219 = arith.addf %210, %218 : vector<2x1x1xf32>
    %c0_46 = arith.constant 0 : index
    %c0_47 = arith.constant 0 : index
    %c0_48 = arith.constant 0 : index
    %220 = vector.load %arg1[%c0_46, %c0_47, %c0_48] : memref<2x1x1xi32, #tpu.memory_space<vmem>>, vector<2x1x1xi32>
    %221 = vector.broadcast %220 : vector<2x1x1xi32> to vector<2x1x128xi32>
    %222 = arith.cmpi eq, %204, %221 : vector<2x1x128xi32>
    %cst_49 = arith.constant 0.000000e+00 : f32
    %223 = vector.broadcast %cst_49 : f32 to vector<2x1x128xf32>
    %224 = arith.select %222, %203, %223 : vector<2x1x128xi1>, vector<2x1x128xf32>
    %cst_50 = arith.constant dense<0.000000e+00> : vector<2x1xf32>
    %225 = vector.multi_reduction <add>, %224, %cst_50 [2] : vector<2x1x128xf32> to vector<2x1xf32>
    %226 = vector.shape_cast %225 : vector<2x1xf32> to vector<2x1x1xf32>
    %227 = arith.subf %219, %226 : vector<2x1x1xf32>
    %cst_51 = arith.constant 1.000000e+00 : f32
    %228 = vector.broadcast %cst_51 : f32 to vector<2x1x1xf32>
    %229 = arith.mulf %228, %227 : vector<2x1x1xf32>
    %cst_52 = arith.constant 1.000000e+00 : f32
    %230 = vector.broadcast %cst_52 : f32 to vector<2x1x128xf32>
    %231 = arith.mulf %230, %202 : vector<2x1x128xf32>
    %232 = vector.broadcast %229 : vector<2x1x1xf32> to vector<2x1x128xf32>
    %233 = arith.addf %232, %231 : vector<2x1x128xf32>
    %cst_53 = arith.constant 1.000000e+00 : f32
    %234 = vector.broadcast %cst_53 : f32 to vector<2x1x128xf32>
    %235 = arith.mulf %234, %188 : vector<2x1x128xf32>
    %236 = arith.addf %233, %235 : vector<2x1x128xf32>
    %237 = vector.broadcast %236 : vector<2x1x128xf32> to vector<2x8x128xf32>
    %238 = arith.addf %58, %237 : vector<2x8x128xf32>
    %c0_54 = arith.constant 0 : index
    %c0_55 = arith.constant 0 : index
    %c0_56 = arith.constant 0 : index
    %239 = vector.load %arg8[%c0_54, %c0_55, %c0_56] : memref<2x8x128xf32, #tpu.memory_space<vmem>>, vector<2x8x128xf32>
    tpu.vector_store %arg8[%c0_54, %c0_55, %c0_56], %238 {strides = array<i32>} : memref<2x8x128xf32, #tpu.memory_space<vmem>>, vector<2x8x128xf32>,
    return
  }
  func.func @transform_0(%arg0: i32) -> (i32, i32, i32) {
    %c0_i32 = arith.constant 0 : i32
    %c0_i32_0 = arith.constant 0 : i32
    %c0_i32_1 = arith.constant 0 : i32
    return %arg0, %c0_i32, %c0_i32_0 : i32, i32, i32
  }
  func.func @transform_1(%arg0: i32) -> (i32, i32, i32) {
    %c0_i32 = arith.constant 0 : i32
    %c0_i32_0 = arith.constant 0 : i32
    %c0_i32_1 = arith.constant 0 : i32
    return %arg0, %c0_i32, %c0_i32_0 : i32, i32, i32
  }
  func.func @transform_2(%arg0: i32) -> (i32, i32, i32) {
    %c0_i32 = arith.constant 0 : i32
    %c0_i32_0 = arith.constant 0 : i32
    %c0_i32_1 = arith.constant 0 : i32
    return %arg0, %c0_i32, %c0_i32_0 : i32, i32, i32
  }
  func.func @transform_3(%arg0: i32) -> (i32, i32, i32) {
    %c0_i32 = arith.constant 0 : i32
    %c0_i32_0 = arith.constant 0 : i32
    %c0_i32_1 = arith.constant 0 : i32
    return %arg0, %c0_i32, %c0_i32_0 : i32, i32, i32
  }
  func.func @transform_4(%arg0: i32) -> (i32, i32, i32) {
    %c0_i32 = arith.constant 0 : i32
    %c0_i32_0 = arith.constant 0 : i32
    %c0_i32_1 = arith.constant 0 : i32
    return %arg0, %c0_i32, %c0_i32_0 : i32, i32, i32
  }
  func.func @transform_5(%arg0: i32) -> (i32, i32, i32) {
    %c0_i32 = arith.constant 0 : i32
    %c0_i32_0 = arith.constant 0 : i32
    %c0_i32_1 = arith.constant 0 : i32
    return %arg0, %c0_i32, %c0_i32_0 : i32, i32, i32
  }
  func.func @transform_6(%arg0: i32) -> (i32, i32, i32) {
    %c0_i32 = arith.constant 0 : i32
    %c0_i32_0 = arith.constant 0 : i32
    %c0_i32_1 = arith.constant 0 : i32
    return %arg0, %c0_i32, %c0_i32_0 : i32, i32, i32
  }
  func.func @transform_7(%arg0: i32) -> (i32, i32, i32) {
    %c0_i32 = arith.constant 0 : i32
    %c0_i32_0 = arith.constant 0 : i32
    %c0_i32_1 = arith.constant 0 : i32
    return %arg0, %c0_i32, %c0_i32_0 : i32, i32, i32
  }
}

</mosaic_0001>

<bundles_post_ra>
// kernel: tpu_custom_call.1
= control target key start
LH: loop header
LB: loop body
LE: loop exit
PB: predicated region body
PF: predicated region fallthrough
CT: control target
= control target key end

     0   :  { %12 = vsyncpa [#allocation3], 0  ;;  %s1129_s0 = inlined_call_operand.vmem [shape: s32[2,1,1], index: 0, kind: input, shape index: {}]   ;;  %s1130_s1 = inlined_call_operand.hbm [shape: f32[2,8,8], index: 1, kind: input, shape index: {}]   ;;  %s1131_s2 = inlined_call_operand.hbm [shape: f32[2,8,128], index: 2, kind: input, shape index: {}]   ;;  %s1132_s3 = inlined_call_operand.hbm [shape: f32[2,8,128], index: 3, kind: input, shape index: {}]   ;;  %s1133_s4 = inlined_call_operand.vmem [shape: f32[2,1,128], index: 4, kind: input, shape index: {}]   ;;  %s1134_s5 = inlined_call_operand.hbm [shape: f32[2,16,128], index: 5, kind: input, shape index: {}]   ;;  %s1135_s6 = inlined_call_operand.hbm [shape: f32[2,16,128], index: 6, kind: input, shape index: {}]   ;;  %s1136_s7 = inlined_call_operand.hbm [shape: f32[2,8,128], index: 7, kind: output, shape index: {}]  }
   0x1   :  { %13 = vsyncpa [#allocation6], 0 }
   0x2   :  { %14 = vsyncpa [#allocation9], 0 }
   0x3   :  { %15 = vsyncpa [#allocation4], 0  ;;  %s35_s26 = sshll.u32 %s1131_s2, 4  ;;  %s782_s27 = smov [#allocation5]   ;;  %s36_s26 = int_to_ptr.hbm [resolvable:$true] %s35_s26 }
   0x4   :  { %s37_s28 = sshll.u32 %s782_s27, 4  ;;  %s63_s8 = sshll.u32 %s1134_s5, 4  ;;  %s38_s28 = int_to_ptr.vmem [resolvable:$true] %s37_s28  ;;  %s64_s8 = int_to_ptr.hbm [resolvable:$true] %s63_s8 }
   0x5   :  { %s783_s9 = smov 128   ;;  %s784_s10 = smov 8  }
   0x6   :  { %43 = dma.hbm_to_vmem [thread:$0]  %s36_s26, 256, %s38_s28, [#allocation6], %s783_s9, %s783_s9, %s784_s10  }
   0x7   :  { %s785_s11 = smov [#allocation8]   ;;  %s22_s2 = sshll.u32 %s1130_s1, 4  ;;  %s23_s2 = int_to_ptr.hbm [resolvable:$true] %s22_s2 }
   0x8   :  { %s65_s12 = sshll.u32 %s785_s11, 4  ;;  %s48_s16 = sshll.u32 %s1132_s3, 4  ;;  %s66_s12 = int_to_ptr.vmem [resolvable:$true] %s65_s12  ;;  %s49_s16 = int_to_ptr.hbm [resolvable:$true] %s48_s16 }
   0x9   :  { %71 = dma.hbm_to_vmem [thread:$0]  %s64_s8, 512, %s66_s12, [#allocation9], %s783_s9, %s783_s9, %s784_s10  }
   0xa   :  { %s786_s17 = smov [#allocation2]   ;;  %s787_s19 = smov [#allocation7]  }
   0xb   :  { %s24_s18 = sshll.u32 %s786_s17, 4  ;;  %s50_s1 = sshll.u32 %s787_s19, 4  ;;  %s25_s18 = int_to_ptr.vmem [resolvable:$true] %s24_s18  ;;  %s51_s1 = int_to_ptr.vmem [resolvable:$true] %s50_s1 }
   0xc   :  { %30 = dma.hbm_to_vmem [thread:$0]  %s23_s2, 256, %s25_s18, [#allocation3], %s783_s9, %s783_s9, %s784_s10  }
   0xd   :  { %s76_s22 = sshll.u32 %s1135_s6, 4  ;;  %s788_s3 = smov [#allocation10]   ;;  %s77_s22 = int_to_ptr.hbm [resolvable:$true] %s76_s22 }
   0xe   :  { %56 = dma.hbm_to_vmem [thread:$0]  %s49_s16, 256, %s51_s1, [#allocation6], %s783_s9, %s783_s9, %s784_s10  }
   0xf   :  { %s78_s23 = sshll.u32 %s788_s3, 4  ;;  %s79_s23 = int_to_ptr.vmem [resolvable:$true] %s78_s23 }
  0x10   :  { %84 = dma.hbm_to_vmem [thread:$0]  %s77_s22, 512, %s79_s23, [#allocation9], %s783_s9, %s783_s9, %s784_s10  }
  0x11   :  { %774 = dma.done.wait [#allocation3], 256  }
  0x12   :  { %775 = vsyncadd [#allocation3], 4294967040 }
  0x13   :  { %776 = dma.done.wait [#allocation6], 512  }
  0x14   :  { %777 = vsyncadd [#allocation6], 4294966784 }
  0x15   :  { %778 = dma.done.wait [#allocation9], 1024  }
  0x16   :  { %779 = vsyncadd [#allocation9], 4294966272  ;;  %v789_v0 = vmov 3   ;;  %v790_v1 = vmov 2   ;;  %v791_v2 = vmov 1   ;;  %v868_v3 = vld [vmem:[#allocation2] sm:$0xff]  ;;  %v485_v8 = vlaneseq }
  0x17   :  { %588 = vset.pattern.permute.xlu0 %v789_v0  ;;  %587 = vset.pattern.permute.xlu2 %v790_v1  ;;  %v873_v4 = vld [vmem:[#allocation2 + $0x8] sm:$0xff]  ;;  %v792_v5 = vmov 0   ;;  %v793_v6 = vmov 4   ;;  %v517_v7 = vld [vmem:[%s1129_s0] sm:$0x1]  ;;  %vm490_vm1 = vcmask 1040384  }
  0x18   :  { %586 = vset.pattern.permute.xlu1 %v791_v2  ;;  %160 = vperm.xlu0 %588, %v868_v3   ;;  %v884_v9 = vand.u32 127, %v485_v8  ;;  %v518_v10 = vld [vmem:[%s1129_s0 + $0x1] sm:$0x1]  ;;  %v898_v12 = vld [vmem:[%s1133_s4] sm:$0x1]  ;;  %v794_v17 = vmov 5  }
  0x19   :  { %144 = vperm.xlu2 %587, %v868_v3   ;;  %128 = vperm.xlu1 %586, %v868_v3   ;;  %v892_v11 = vld [vmem:[%s1133_s4 + $0x1] sm:$0x1]  ;;  %v795_v18 = vmov 6   ;;  %v919_v32 = vld [vmem:[#allocation7 + $0x8] sm:$0xff]  ;;  %s797_s0 = smov [#allocation11]   ;;  %s555_s12 = sshll.u32 %s1136_s7, 4  ;;  %s556_s12 = int_to_ptr.hbm [resolvable:$true] %s555_s12 }
  0x1a   :  { %vm487_vm0 = vcmp.lt.s32.totalorder %v884_v9, 8  ;;  %v913_v21 = vld [vmem:[#allocation7] sm:$0xff]  ;;  %v136_v35 = vperm.slane %v919_v32, 1  ;;  %v152_v39 = vperm.slane %v919_v32, 2  ;;  %v120_v41 = vperm.slane %v919_v32, 0  ;;  %s553_s4 = sshll.u32 %s797_s0, 4  ;;  %s554_s4 = int_to_ptr.vmem [resolvable:$true] %s553_s4 }
  0x1b   :  { %v489_v13 = vsel %vm487_vm0, %v892_v11, -1e+30  ;;  %v488_v14 = vsel %vm487_vm0, %v898_v12, -1e+30  ;;  %v135_v23 = vperm.slane %v913_v21, 1  ;;  %v151_v25 = vperm.slane %v913_v21, 2 }
  0x1c   :  { %v494_v15 = vsel %vm490_vm1, %v489_v13, -inf  ;;  %v491_v16 = vsel %vm490_vm1, %v488_v14, -inf  ;;  %v119_v26 = vperm.slane %v913_v21, 0  ;;  %v167_v28 = vperm.slane %v913_v21, 3 }
  0x1d   :  { %v168_v45 = vperm.slane %v919_v32, 3 }
  0x20   :  { %164 = vperm.xlu0 %588, %v873_v4  }
  0x21   :  { %148 = vperm.xlu2 %587, %v873_v4   ;;  %132 = vperm.xlu1 %586, %v873_v4  }
  0x28   :  { %589 = vset.pattern.permute.xlu0 %v792_v5 }
  0x29   :  { %111 = vperm.xlu0 %589, %v868_v3   ;;  %591 = vset.pattern.permute.xlu1 %v793_v6 }
  0x2a   :  { %590 = vset.pattern.permute.xlu2 %v793_v6 }
  0x31   :  { %116 = vperm.xlu0 %589, %v873_v4  }
  0x39   :  { %520 = vperm.xlu0 %589, %v517_v7  }
  0x41   :  { %524 = vperm.xlu0 %589, %v518_v10  }
  0x49   :  { %593 = vset.pattern.permute.xlu0 %v795_v18 }
  0x4a   :  { %495 = vmax.xlane.f32.xlu2 %v494_v15  ;;  %v796_v15 = vmov 7  }
  0x4b   :  { %492 = vmax.xlane.f32.xlu1 %v491_v16 }
  0x62   :  { %176 = vperm.xlu2 %590, %v868_v3  }
  0x64   :  { %180 = vperm.xlu1 %591, %v873_v4  }
  0x6a   :  { %594 = vset.pattern.permute.xlu2 %v795_v18 }
  0x6b   :  { %212 = vperm.xlu2 %594, %v873_v4  }
  0x6c   :  { %592 = vset.pattern.permute.xlu1 %v794_v17 }
  0x6d   :  { %192 = vperm.xlu1 %592, %v868_v3  }
  0x73   :  { %v145_v24 = vpop.permute.xlu2 %144  ;;  %596 = vset.pattern.permute.xlu2 %v796_v15 }
  0x74   :  { %v153_v30 = vsub.f32 %v145_v24, %v151_v25  ;;  %v954_v24 = vld [vmem:[#allocation8 + $0x10] sm:$0xff]  ;;  %v956_v25 = vld [vmem:[#allocation8 + $0x18] sm:$0xff] }
  0x75   :  { %196 = vperm.xlu1 %592, %v873_v4  }
  0x76   :  { %v155_v38 = vand.u32 2147483647, %v153_v30 }
  0x7b   :  { %v149_v42 = vpop.permute.xlu2 %148 }
  0x7c   :  { %v154_v48 = vsub.f32 %v149_v42, %v152_v39 }
  0x7d   :  { %595 = vset.pattern.permute.xlu1 %v796_v15 }
  0x7e   :  { %v156_v54 = vand.u32 2147483647, %v154_v48 }
  0x8a   :  { %v161_v19 = vpop.permute.xlu0 %160 }
  0x8b   :  { %v129_v22 = vpop.permute.xlu1 %128  ;;  %v169_v34 = vsub.f32 %v161_v19, %v167_v28  ;;  %v962_v28 = vld [vmem:[#allocation8 + $0x8] sm:$0xff] }
  0x8c   :  { %v137_v27 = vsub.f32 %v129_v22, %v135_v23  ;;  %v254_v23 = vmul.f32 0.5, %v919_v32 }
  0x8d   :  { %v171_v43 = vand.u32 2147483647, %v169_v34 }
  0x8e   :  { %v139_v33 = vand.u32 2147483647, %v137_v27  ;;  %v960_v27 = vld [vmem:[#allocation8] sm:$0xff] }
  0x92   :  { %v165_v20 = vpop.permute.xlu0 %164 }
  0x93   :  { %v133_v37 = vpop.permute.xlu1 %132  ;;  %v170_v52 = vsub.f32 %v165_v20, %v168_v45  ;;  %v240_v20 = vld [vmem:[#allocation5 + $0x8] sm:$0xff] }
  0x94   :  { %v138_v44 = vsub.f32 %v133_v37, %v136_v35  ;;  %v242_v22 = vmul.f32 0.5, %v240_v20 }
  0x95   :  { %v172_v56 = vand.u32 2147483647, %v170_v52  ;;  %v239_v52 = vld [vmem:[#allocation5] sm:$0xff] }
  0x96   :  { %v140_v51 = vand.u32 2147483647, %v138_v44 }
  0x9b   :  { %v112_v29 = vpop.permute.xlu0 %111 }
  0x9c   :  { %v121_v31 = vsub.f32 %v112_v29, %v119_v26  ;;  %v416_v26 = vand.u32 2147483647, %v956_v25  ;;  %v258_v29 = vrot.slane %v254_v23, 2  ;;  %v399_v23 = vld [vmem:[#allocation10 + $0x10] sm:$0xff] }
  0x9e   :  { %v123_v36 = vand.u32 2147483647, %v121_v31  ;;  %v420_v31 = vsub.f32 0.0, %v416_v26  ;;  %v262_v37 = vsub.f32 %v919_v32, %v258_v29 }
  0xa0   :  { %v141_v40 = vadd.f32 %v139_v33, %v123_v36  ;;  %v427_v36 = vmul.f32 1.442695, %v420_v31  ;;  %v404_v31 = vmax.f32 %v956_v25, 0.0 }
  0xa2   :  { %v157_v46 = vadd.f32 %v155_v38, %v141_v40  ;;  %v264_v38 = vadd.f32 %v258_v29, %v919_v32 }
  0xa3   :  { %v117_v47 = vpop.permute.xlu0 %116 }
  0xa4   :  { %v122_v49 = vsub.f32 %v117_v47, %v120_v41  ;;  %v925_v50 = vadd.f32 %v171_v43, %v157_v46  ;;  %v276_v42 = vsub.f32 %v264_v38, %v262_v37 }
  0xa6   :  { %v124_v53 = vand.u32 2147483647, %v122_v49  ;;  %v280_v46 = vrot.slane %v276_v42, 1 }
  0xa8   :  { %v142_v55 = vadd.f32 %v140_v51, %v124_v53 }
  0xaa   :  { %v158_v57 = vadd.f32 %v156_v54, %v142_v55  ;;  %v284_v54 = vmul.f32 %v280_v46, %v276_v42 }
  0xab   :  { %v521_v58 = vpop.permute.xlu0 %520 }
  0xac   :  { %v522_v59 = vperm.slane %v521_v58, 0  ;;  %v927_v60 = vadd.f32 %v172_v56, %v158_v57 }
  0xae   :  { %vm527_vm2 = vcmp.eq.s32.totalorder %v884_v9, %v522_v59 }
  0xaf   :  { %v529_v61 = vsel %vm527_vm2, %v898_v12, 0.0 }
  0xb0   :  { %v531_v62 = vsel %vm490_vm1, %v529_v61, 0.0  ;;  %v241_v61 = vmul.f32 0.5, %v239_v52 }
  0xb1   :  { %532 = vadd.xlane.f32.xlu1 %v531_v62  ;;  %v253_v62 = vmul.f32 0.5, %v913_v21 }
  0xb3   :  { %v525_v63 = vpop.permute.xlu0 %524 }
  0xb4   :  { %v526_v0 = vperm.slane %v525_v63, 0 }
  0xb6   :  { %vm528_vm3 = vcmp.eq.s32.totalorder %v884_v9, %v526_v0  ;;  %v415_v9 = vand.u32 2147483647, %v954_v24 }
  0xb7   :  { %v530_v1 = vsel %vm528_vm3, %v892_v11, 0.0 }
  0xb8   :  { %v534_v2 = vsel %vm490_vm1, %v530_v1, 0.0  ;;  %v419_v30 = vsub.f32 0.0, %v415_v9  ;;  %v400_v9 = vld [vmem:[#allocation10 + $0x18] sm:$0xff] }
  0xb9   :  { %535 = vadd.xlane.f32.xlu0 %v534_v2 }
  0xba   :  { %v425_v35 = vmul.f32 1.442695, %v419_v30  ;;  %v403_v30 = vmax.f32 %v954_v24, 0.0 }
  0xbd   :  { %v935_v6 = vpop.xlane.xlu2 %495 }
  0xbe   :  { %v498_v7 = vsub.f32 %v892_v11, %v935_v6  ;;  %v939_v8 = vpop.xlane.xlu1 %492 }
  0xbf   :  { %v497_v13 = vsub.f32 %v898_v12, %v939_v8 }
  0xc0   :  { %v501_v10 = vmul.f32 1.442695, %v498_v7 }
  0xc1   :  { %v499_v14 = vmul.f32 1.442695, %v497_v13  ;;  %v257_v13 = vrot.slane %v253_v62, 2 }
  0xc2   :  { %598 = vpow2.f32 %v501_v10  ;;  %v245_v10 = vrot.slane %v241_v61, 2  ;;  %v398_v61 = vld [vmem:[#allocation10 + $0x8] sm:$0xff] }
  0xc3   :  { %600 = vpow2.f32 %v499_v14 }
  0xc4   :  { %602 = vpow2.f32 %v425_v35 }
  0xc5   :  { %604 = vpow2.f32 %v427_v36  ;;  %v407_v36 = vmul.f32 %v399_v23, %v954_v24 }
  0xc8   :  { %v599_v16 = vpop.eup %598 }
  0xc9   :  { %v504_v17 = vsel %vm487_vm0, %v599_v16, 0.0  ;;  %v601_v18 = vpop.eup %600 }
  0xca   :  { %v508_v19 = vsel %vm490_vm1, %v504_v17, 0.0  ;;  %v503_v11 = vsel %vm487_vm0, %v601_v18, 0.0  ;;  %224 = vperm.xlu1 %595, %v868_v3   ;;  %v603_v57 = vpop.eup %602 }
  0xcb   :  { %509 = vadd.xlane.f32.xlu2 %v508_v19  ;;  %v505_v12 = vsel %vm490_vm1, %v503_v11, 0.0  ;;  %v605_v58 = vpop.eup %604  ;;  %v447_v63 = vadd.f32 1.0, %v603_v57  ;;  %v450_v15 = vmul.f32 -0.5, %v603_v57  ;;  %v249_v11 = vsub.f32 %v239_v52, %v245_v10 }
  0xcc   :  { %506 = vadd.xlane.f32.xlu0 %v505_v12  ;;  %v456_v2 = vadd.f32 1.0, %v605_v58  ;;  %v459_v18 = vmul.f32 -0.5, %v605_v58  ;;  %v251_v12 = vadd.f32 %v245_v10, %v239_v52  ;;  %v462_v42 = vand.u32 2147483647, %v605_v58 }
  0xcd   :  { %v402_v10 = vmax.f32 %v962_v28, 0.0 }
  0xce   :  { %vm998_vm5 = vcmp.lt.f32.partialorder %v462_v42, 0.0004427343 }
  0xe0   :  { %208 = vperm.xlu0 %593, %v868_v3   ;;  %v413_v3 = vand.u32 2147483647, %v960_v27 }
  0xe2   :  { %v417_v39 = vsub.f32 0.0, %v413_v3  ;;  %v451_v3 = vadd.f32 1.0, %v450_v15 }
  0xe3   :  { %228 = vperm.xlu2 %596, %v873_v4   ;;  %v414_v4 = vand.u32 2147483647, %v962_v28 }
  0xe4   :  { %v421_v47 = vmul.f32 1.442695, %v417_v39 }
  0xe5   :  { %v418_v40 = vsub.f32 0.0, %v414_v4 }
  0xe6   :  { %606 = vpow2.f32 %v421_v47 }
  0xe7   :  { %v423_v49 = vmul.f32 1.442695, %v418_v40 }
  0xe8   :  { %597 = vset.pattern.permute.xlu0 %v792_v5  ;;  %v246_v5 = vrot.slane %v242_v22, 2  ;;  %v263_v22 = vadd.f32 %v257_v13, %v913_v21 }
  0xe9   :  { %608 = vpow2.f32 %v423_v49 }
  0xea   :  { %v250_v33 = vsub.f32 %v240_v20, %v246_v5  ;;  %v252_v34 = vadd.f32 %v246_v5, %v240_v20  ;;  %610 = vlog2.f32 %v447_v63  ;;  %v261_v20 = vsub.f32 %v913_v21, %v257_v13 }
  0xeb   :  { %612 = vlog2.f32 %v456_v2  ;;  %v265_v5 = vsub.f32 %v251_v12, %v249_v11  ;;  %v401_v2 = vmax.f32 %v960_v27, 0.0 }
  0xec   :  { %v266_v41 = vsub.f32 %v252_v34, %v250_v33  ;;  %v286_v43 = vmin.f32 %v252_v34, %v264_v38  ;;  %v288_v44 = vmax.f32 %v250_v33, %v262_v37  ;;  %v336_v51 = vmax.f32 %v252_v34, %v264_v38  ;;  %v971_v14 = vpop.eup %606 }
  0xed   :  { %v338_v56 = vmin.f32 %v250_v33, %v262_v37  ;;  %v429_v26 = vadd.f32 1.0, %v971_v14  ;;  %v275_v29 = vsub.f32 %v263_v22, %v261_v20  ;;  %v460_v33 = vadd.f32 1.0, %v459_v18 }
  0xee   :  { %v270_v45 = vrot.slane %v266_v41, 1  ;;  %v290_v48 = vsub.f32 %v286_v43, %v288_v44  ;;  %v408_v37 = vmul.f32 %v400_v9, %v956_v25  ;;  %v285_v38 = vmin.f32 %v251_v12, %v263_v22 }
  0xef   :  { %v340_v1 = vsub.f32 %v336_v51, %v338_v56  ;;  %v976_v19 = vpop.eup %608  ;;  %v287_v39 = vmax.f32 %v249_v11, %v261_v20  ;;  %v432_v43 = vmul.f32 -0.5, %v971_v14  ;;  %v452_v44 = vmul.f32 %v603_v57, %v451_v3 }
  0xf0   :  { %v274_v53 = vmul.f32 %v270_v45, %v266_v41  ;;  %v292_v55 = vmax.f32 %v290_v48, 0.0  ;;  %v438_v34 = vadd.f32 1.0, %v976_v19  ;;  %v611_v35 = vpop.eup %610  ;;  %v453_v41 = vand.u32 2147483647, %v603_v57 }
  0xf1   :  { %v344_v17 = vrot.slane %v340_v1, 1  ;;  %v613_v40 = vpop.eup %612  ;;  %v269_v45 = vrot.slane %v265_v5, 1  ;;  %v279_v46 = vrot.slane %v275_v29, 1  ;;  %v461_v48 = vmul.f32 %v605_v58, %v460_v33  ;;  %v397_v58 = vld [vmem:[#allocation10] sm:$0xff] }
  0xf2   :  { %v296_v59 = vrot.slane %v292_v55, 1  ;;  %v302_v0 = vadd.f32 %v284_v54, %v274_v53  ;;  %v441_v24 = vmul.f32 -0.5, %v976_v19  ;;  %v335_v25 = vmax.f32 %v251_v12, %v263_v22 }
  0xf3   :  { %v982_v4 = vmul.f32 %v344_v17, %v340_v1  ;;  %v449_v49 = vmul.f32 0.6931472, %v611_v35  ;;  %v458_v51 = vmul.f32 0.6931472, %v613_v40  ;;  %v289_v52 = vsub.f32 %v285_v38, %v287_v39 }
  0xf4   :  { %v969_v7 = vmul.f32 %v296_v59, %v292_v55  ;;  %v337_v53 = vmin.f32 %v249_v11, %v261_v20  ;;  %v411_v54 = vsub.f32 %v403_v30, %v407_v36  ;;  %vm994_vm4 = vcmp.lt.f32.partialorder %v453_v41, 0.0004427343 }
  0xf5   :  { %v433_v57 = vadd.f32 1.0, %v432_v43  ;;  %v412_v59 = vsub.f32 %v404_v31, %v408_v37  ;;  %v273_v63 = vmul.f32 %v269_v45, %v265_v5  ;;  %v435_v13 = vand.u32 2147483647, %v971_v14 }
  0xf6   :  { %v974_v16 = vsub.f32 %v302_v0, %v969_v7  ;;  %v283_v0 = vmul.f32 %v279_v46, %v275_v29  ;;  %v442_v15 = vadd.f32 1.0, %v441_v24  ;;  %v455_v18 = vsel %vm994_vm4, %v452_v44, %v449_v49 }
  0xf7   :  { %v464_v11 = vsel %vm998_vm5, %v461_v48, %v458_v51  ;;  %v291_v12 = vmax.f32 %v289_v52, 0.0  ;;  %v339_v20 = vsub.f32 %v335_v25, %v337_v53  ;;  %v405_v23 = vmul.f32 %v397_v58, %v960_v27  ;;  %v1046_v25 = vpop.permute.xlu2 %176 }
  0xf8   :  { %614 = vrcp.f32 %v974_v16  ;;  %v406_v9 = vmul.f32 %v398_v61, %v962_v28  ;;  %v444_v3 = vand.u32 2147483647, %v976_v19  ;;  %v301_v31 = vadd.f32 %v283_v0, %v273_v63 }
  0xf9   :  { %616 = vlog2.f32 %v429_v26  ;;  %v434_v26 = vmul.f32 %v971_v14, %v433_v57  ;;  %v295_v30 = vrot.slane %v291_v12, 1  ;;  %v467_v33 = vadd.f32 %v455_v18, %v411_v54  ;;  %v1025_v14 = vpop.permute.xlu1 %180 }
  0xfa   :  { %618 = vrcp.f32 %v982_v4  ;;  %v343_v36 = vrot.slane %v339_v20, 1  ;;  %vm1019_vm6 = vcmp.lt.f32.partialorder %v435_v13, 0.0004427343  ;;  %v409_v38 = vsub.f32 %v401_v2, %v405_v23 }
  0xfb   :  { %620 = vlog2.f32 %v438_v34  ;;  %v468_v34 = vadd.f32 %v464_v11, %v412_v59  ;;  %v1023_v28 = vmul.f32 %v295_v30, %v291_v12  ;;  %v443_v40 = vmul.f32 %v976_v19, %v442_v15 }
  0xfc   :  { %v1028_v41 = vmul.f32 %v343_v36, %v339_v20  ;;  %v410_v42 = vsub.f32 %v402_v10, %v406_v9  ;;  %vm1030_vm7 = vcmp.lt.f32.partialorder %v444_v3, 0.0004427343  ;;  %vm325_vm8 = vweird.f32 %v974_v16 }
  0xfd   :  { %v1036_v45 = vsub.f32 %v301_v31, %v1023_v28  ;;  %v476_v46 = vadd.f32 %v468_v34, %v467_v33  ;;  %v331_v19 = vand.u32 2147483648, %v974_v16  ;;  %v329_v51 = vand.u32 2147483647, %v974_v16 }
  0xfe   :  { %v991_v47 = vpop.eup %614  ;;  %622 = vrcp.f32 %v1028_v41  ;;  %vm371_vm10 = vweird.f32 %v982_v4  ;;  %v377_v53 = vand.u32 2147483648, %v982_v4  ;;  %v375_v57 = vand.u32 2147483647, %v982_v4 }
  0xff   :  { %v321_v62 = vmul.f32 %v991_v47, %v974_v16  ;;  %v617_v1 = vpop.eup %616  ;;  %vm326_vm9 = vweird.f32 %v991_v47  ;;  %624 = vrcp.f32 %v1036_v45  ;;  %v477_v54 = vrot.slane %v476_v46, 4 }
 0x100   :  { %v1007_v17 = vpop.eup %618  ;;  %v431_v35 = vmul.f32 0.6931472, %v617_v1  ;;  %vm1055_vm12 = vmor %vm325_vm8, %vm326_vm9  ;;  %vm1065_vm14 = vcmp.eq.f32.partialorder %v329_v51, 8.507059e+37  ;;  %v332_v0 = vor.u32 1.1754944e-38, %v331_v19  ;;  %v350_v10 = vsub.f32 %v982_v4, %v974_v16 }
 0x101   :  { %v621_v22 = vpop.eup %620  ;;  %v322_v5 = vsub.f32 1.0, %v321_v62  ;;  %v367_v29 = vmul.f32 %v1007_v17, %v982_v4  ;;  %vm372_vm11 = vweird.f32 %v1007_v17  ;;  %v378_v13 = vor.u32 1.1754944e-38, %v377_v53  ;;  %v1075_v18 = vpop.permute.xlu1 %192 }
 0x102   :  { %v440_v39 = vmul.f32 0.6931472, %v621_v22  ;;  %v437_v48 = vsel %vm1019_vm6, %v434_v26, %v431_v35  ;;  %vm1061_vm13 = vmor %vm371_vm10, %vm372_vm11  ;;  %v478_v11 = vadd.f32 %v477_v54, %v476_v46  ;;  %vm376_vm15 = vcmp.eq.f32.partialorder %v375_v57, 8.507059e+37 }
 0x103   :  { %v368_v27 = vsub.f32 1.0, %v367_v29  ;;  %v323_v44 = vmul.f32 %v991_v47, %v322_v5  ;;  %v465_v59 = vadd.f32 %v437_v48, %v409_v38  ;;  %vm356_vm0 = vweird.f32 %v1028_v41 }
 0x104   :  { %v446_v49 = vsel %vm1030_vm7, %v443_v40, %v440_v39  ;;  %v623_v62 = vpop.eup %622  ;;  %vm310_vm2 = vweird.f32 %v1036_v45  ;;  %v316_v26 = vand.u32 2147483648, %v1036_v45  ;;  %v362_v3 = vand.u32 2147483648, %v1028_v41 }
 0x105   :  { %v369_v24 = vmul.f32 %v1007_v17, %v368_v27  ;;  %v324_v52 = vadd.f32 %v991_v47, %v323_v44  ;;  %v466_v58 = vadd.f32 %v446_v49, %v410_v42  ;;  %v625_v1 = vpop.eup %624  ;;  %v352_v15 = vmul.f32 %v623_v62, %v1028_v41 }
 0x106   :  { %v306_v20 = vmul.f32 %v625_v1, %v1036_v45  ;;  %vm357_vm1 = vweird.f32 %v623_v62  ;;  %vm311_vm3 = vweird.f32 %v625_v1  ;;  %v314_v30 = vand.u32 2147483647, %v1036_v45 }
 0x107   :  { %v370_v56 = vadd.f32 %v1007_v17, %v369_v24  ;;  %v328_v2 = vsel %vm1055_vm12, %v991_v47, %v324_v52  ;;  %v469_v22 = vadd.f32 %v466_v58, %v465_v59  ;;  %v353_v23 = vsub.f32 1.0, %v352_v15  ;;  %v213_v47 = vpop.permute.xlu2 %212  ;;  %vm1090_vm4 = vmor %vm356_vm0, %vm357_vm1 }
 0x108   :  { %v333_v16 = vsel %vm1065_vm14, %v332_v0, %v328_v2  ;;  %v307_v4 = vsub.f32 1.0, %v306_v20  ;;  %v360_v33 = vand.u32 2147483647, %v1028_v41  ;;  %vm1095_vm5 = vmor %vm310_vm2, %vm311_vm3  ;;  %v184_v39 = vperm.slane %v919_v32, 4 }
 0x109   :  { %v374_v12 = vsel %vm1061_vm13, %v1007_v17, %v370_v56  ;;  %v354_v17 = vmul.f32 %v623_v62, %v353_v23  ;;  %v470_v34 = vrot.slane %v469_v22, 4  ;;  %v334_v37 = vmul.f32 %v333_v16, %v969_v7  ;;  %v197_v19 = vpop.permute.xlu1 %196 }
 0x10a   :  { %v379_v9 = vsel %vm376_vm15, %v378_v13, %v374_v12  ;;  %v308_v29 = vmul.f32 %v625_v1, %v307_v4  ;;  %v479_v40 = vrot.slane %v478_v11, 2  ;;  %v317_v42 = vor.u32 1.1754944e-38, %v316_v26 }
 0x10b   :  { %v355_v36 = vadd.f32 %v623_v62, %v354_v17  ;;  %v380_v27 = vmul.f32 %v379_v9, %v350_v10  ;;  %v363_v43 = vor.u32 1.1754944e-38, %v362_v3  ;;  %vm315_vm6 = vcmp.eq.f32.partialorder %v314_v30, 8.507059e+37 }
 0x10c   :  { %v309_v38 = vadd.f32 %v625_v1, %v308_v29  ;;  %vm361_vm7 = vcmp.eq.f32.partialorder %v360_v33, 8.507059e+37  ;;  %v200_v48 = vperm.slane %v919_v32, 5  ;;  %v471_v24 = vadd.f32 %v470_v34, %v469_v22 }
 0x10d   :  { %v359_v46 = vsel %vm1090_vm4, %v623_v62, %v355_v36  ;;  %v382_v49 = vsub.f32 %v334_v37, %v380_v27  ;;  %v349_v51 = vsub.f32 %v1028_v41, %v1036_v45  ;;  %v186_v52 = vsub.f32 %v1025_v14, %v184_v39 }
 0x10e   :  { %v313_v44 = vsel %vm1095_vm5, %v625_v1, %v309_v38  ;;  %v364_v54 = vsel %vm361_vm7, %v363_v43, %v359_v46  ;;  %v480_v55 = vadd.f32 %v479_v40, %v478_v11  ;;  %v202_v57 = vsub.f32 %v197_v19, %v200_v48 }
 0x10f   :  { %v318_v53 = vsel %vm315_vm6, %v317_v42, %v313_v44  ;;  %v216_v59 = vperm.slane %v919_v32, 6  ;;  %v472_v58 = vrot.slane %v471_v24, 2  ;;  %v384_v61 = vsub.f32 1.0, %v382_v49 }
 0x110   :  { %v319_v62 = vmul.f32 %v318_v53, %v1023_v28  ;;  %v365_v63 = vmul.f32 %v364_v54, %v349_v51  ;;  %v188_v0 = vand.u32 2147483647, %v186_v52  ;;  %v481_v1 = vrot.slane %v480_v55, 1 }
 0x111   :  { %v232_v41 = vperm.slane %v919_v32, 7  ;;  %v204_v14 = vand.u32 2147483647, %v202_v57  ;;  %v218_v2 = vsub.f32 %v213_v47, %v216_v59  ;;  %v473_v10 = vadd.f32 %v472_v58, %v471_v24 }
 0x112   :  { %v388_v15 = vrot.slane %v384_v61, 4  ;;  %v381_v12 = vsub.f32 %v319_v62, %v365_v63  ;;  %v183_v22 = vperm.slane %v913_v21, 4  ;;  %v190_v23 = vadd.f32 %v188_v0, %v927_v60 }
 0x113   :  { %v482_v28 = vadd.f32 %v481_v1, %v480_v55  ;;  %v199_v32 = vperm.slane %v913_v21, 5  ;;  %v220_v47 = vand.u32 2147483647, %v218_v2  ;;  %v474_v3 = vrot.slane %v473_v10, 1 }
 0x114   :  { %v206_v17 = vadd.f32 %v204_v14, %v190_v23  ;;  %v392_v31 = vadd.f32 %v388_v15, %v384_v61  ;;  %v383_v33 = vsub.f32 1.0, %v381_v12  ;;  %v185_v34 = vsub.f32 %v1046_v25, %v183_v22 }
 0x115   :  { %v201_v36 = vsub.f32 %v1075_v18, %v199_v32  ;;  %v475_v37 = vadd.f32 %v474_v3, %v473_v10  ;;  %v231_v39 = vperm.slane %v913_v21, 7 }
 0x116   :  { %v387_v40 = vrot.slane %v383_v33, 4  ;;  %v187_v43 = vand.u32 2147483647, %v185_v34 }
 0x117   :  { %v203_v46 = vand.u32 2147483647, %v201_v36 }
 0x118   :  { %v391_v24 = vadd.f32 %v387_v40, %v383_v33  ;;  %v189_v18 = vadd.f32 %v187_v43, %v925_v50 }
 0x11a   :  { %v205_v51 = vadd.f32 %v203_v46, %v189_v18 }
 0x124   :  { %v533_v16 = vpop.xlane.xlu1 %532 }
 0x12c   :  { %v1087_v5 = vpop.xlane.xlu0 %535 }
 0x13c   :  { %v225_v42 = vpop.permute.xlu1 %224 }
 0x13d   :  { %v233_v19 = vsub.f32 %v225_v42, %v231_v39 }
 0x13e   :  { %v510_v7 = vpop.xlane.xlu2 %509 }
 0x13f   :  { %626 = vlog2.f32 %v510_v7  ;;  %v507_v56 = vpop.xlane.xlu0 %506  ;;  %v235_v54 = vand.u32 2147483647, %v233_v19 }
 0x140   :  { %628 = vlog2.f32 %v507_v56 }
 0x145   :  { %v627_v45 = vpop.eup %626 }
 0x146   :  { %v514_v13 = vmul.f32 0.6931472, %v627_v45  ;;  %v229_v11 = vpop.permute.xlu2 %228  ;;  %v629_v20 = vpop.eup %628 }
 0x147   :  { %v512_v9 = vmul.f32 0.6931472, %v629_v20  ;;  %v234_v26 = vsub.f32 %v229_v11, %v232_v41 }
 0x148   :  { %v516_v4 = vadd.f32 %v514_v13, %v935_v6  ;;  %v222_v6 = vadd.f32 %v220_v47, %v206_v17 }
 0x149   :  { %v515_v30 = vadd.f32 %v512_v9, %v939_v8  ;;  %v236_v35 = vand.u32 2147483647, %v234_v26  ;;  %v215_v8 = vperm.slane %v913_v21, 6 }
 0x14a   :  { %v538_v29 = vsub.f32 %v516_v4, %v1087_v5 }
 0x14b   :  { %v537_v27 = vsub.f32 %v515_v30, %v533_v16  ;;  %v238_v44 = vadd.f32 %v236_v35, %v222_v6 }
 0x14c   :  { %v540_v60 = vadd.f32 %v538_v29, %v482_v28 }
 0x14d   :  { %v539_v48 = vadd.f32 %v537_v27, %v475_v37 }
 0x14e   :  { %v542_v38 = vadd.f32 %v540_v60, %v392_v31 }
 0x14f   :  { %v541_v53 = vadd.f32 %v539_v48, %v391_v24 }
 0x150   :  { %v544_v5 = vperm.slane %v542_v38, 0 }
 0x151   :  { %v543_v21 = vperm.slane %v541_v53, 0 }
 0x152   :  { %v546_v25 = vadd.f32 %v544_v5, %v238_v44  ;;  %v209_v7 = vpop.permute.xlu0 %208 }
 0x153   :  { %v217_v49 = vsub.f32 %v209_v7, %v215_v8 }
 0x154   :  { %548 = vst [vmem:[#allocation11 + $0x8] sm:$0xff] %v546_v25 }
 0x155   :  { %v219_v52 = vand.u32 2147483647, %v217_v49 }
 0x157   :  { %v221_v55 = vadd.f32 %v219_v52, %v205_v51 }
 0x159   :  { %v237_v56 = vadd.f32 %v235_v54, %v221_v55 }
 0x15b   :  { %v545_v57 = vadd.f32 %v543_v21, %v237_v56 }
 0x15d   :  { %547 = vst [vmem:[#allocation11] sm:$0xff] %v545_v57 }
 0x15e   :  { %561 = dma.vmem_to_hbm [thread:$0]  %s554_s4, 256, %s556_s12, [#allocation4], %s783_s9, %s783_s9, %s784_s10  }
 0x15f   :  { %780 = dma.done.wait [#allocation4], 256  }
 0x160   :  { %781 = vsyncadd [#allocation4], 4294967040 }
 0x161   :  { %566 = vsyncpa [#allocation3], 1 }
 0x162   :  { %567 = vsyncpa [#allocation6], 1 }
 0x163   :  { %568 = vsyncpa [#allocation9], 1 }
 0x164   :  { %569 = vsyncpa [#allocation4], 1 }

</bundles_post_ra>
